<compile_context>
chip_gen: v6e
topology: v6e:2x2x1
jax: 0.10.0
libtpu: 0.0.40
codegen_flags: <defaults>
</compile_context>

<pallas_src>
import jax
import jax.numpy as jnp
from jax.experimental import pallas as pl
from jax.experimental.pallas import tpu as pltpu


# Default tile sizes for non-tiny problems.  VMEM footprint at 512^3 f32:
#   2*(tm*tk + tk*tn)*4 + 2*tm*tn*4  ~= 6 MiB  (fits 16/32/32 MiB scoped VMEM).
_TM, _TN, _TK = 512, 512, 512


def _round_up(x, m):
    return ((x + m - 1) // m) * m


def _linear_kernel_f32(x_ref, w_ref, b_ref, o_ref):
    """f32 output path: accumulate straight into the output block.

    The output BlockSpec ignores the k grid axis, so o_ref stays VMEM-resident
    across the whole K reduction; seeding it with the broadcast bias at k == 0
    removes both the scratch accumulator and the epilogue add.
    """
    @pl.when(pl.program_id(2) == 0)
    def _():
        o_ref[...] = jnp.broadcast_to(b_ref[...], o_ref.shape).astype(o_ref.dtype)

    o_ref[...] += jnp.dot(
        x_ref[...], w_ref[...], preferred_element_type=jnp.float32
    )


def _linear_kernel_generic(x_ref, w_ref, b_ref, o_ref, acc_ref):
    """Non-f32 output path: f32 VMEM accumulator, cast/store on last k step."""
    @pl.when(pl.program_id(2) == 0)
    def _():
        acc_ref[...] = jnp.broadcast_to(b_ref[...], acc_ref.shape).astype(
            jnp.float32
        )

    acc_ref[...] += jnp.dot(
        x_ref[...], w_ref[...], preferred_element_type=jnp.float32
    )

    @pl.when(pl.program_id(2) == pl.num_programs(2) - 1)
    def _():
        o_ref[...] = acc_ref[...].astype(o_ref.dtype)


def pack_linear_params(weight, bias, *, tn=_TN, tk=_TK):
    """One-time layout transform; call at parameter-init time, NOT per forward.

    weight: (N, K) in PyTorch nn.Linear layout, bias: (N,).
    Returns (w_packed, b_packed, meta):
      w_packed: (Kp, Np) = weight.T, padded to tile multiples only when a dim
                is actually tiled (small dims keep their full extent as the
                block shape -> zero padding for the tiny case).
      b_packed: (1, Np)
      meta:     static tiling info consumed by linear_forward.
    """
    N, K = weight.shape
    # A block dim equal to the full array dim waives the (8,128) divisibility
    # rule, so small N / K are kept at full extent with no zero-inflation.
    tn = N if N <= tn else tn
    tk = K if K <= tk else tk
    Np = _round_up(N, tn)
    Kp = _round_up(K, tk)

    w_t = weight.T  # (K, N): MXU-native contraction layout, done exactly once.
    if (Kp, Np) != (K, N):
        w_t = jnp.pad(w_t, ((0, Kp - K), (0, Np - N)))
    b = bias if Np == N else jnp.pad(bias, (0, Np - N))
    meta = {"n": N, "k": K, "tn": tn, "tk": tk}
    return w_t, b.reshape(1, Np), meta


def linear_forward(x, w_packed, b_packed, meta, *, tm=_TM):
    """y = x @ weight.T + bias with pre-packed params (see pack_linear_params)."""
    M, K = x.shape
    assert K == meta["k"], (K, meta["k"])
    N, tn, tk = meta["n"], meta["tn"], meta["tk"]
    Kp, Np = w_packed.shape

    tm = M if M <= tm else tm
    Mp = _round_up(M, tm)

    # Only touch x if an M/K tile remainder actually exists (never for the
    # tiny single-block case); zero padding is exact for matmul + bias.
    if (Mp, Kp) != (M, K):
        x = jnp.pad(x, ((0, Mp - M), (0, Kp - K)))

    gm, gn, gk = Mp // tm, Np // tn, Kp // tk
    grid = (gm, gn, gk)

    out_dtype = x.dtype
    if out_dtype == jnp.dtype(jnp.float32):
        kernel = _linear_kernel_f32
        scratch_shapes = []
    else:
        kernel = _linear_kernel_generic
        scratch_shapes = [pltpu.VMEM((tm, tn), jnp.float32)]

    # Truthful byte count: x is streamed once per N-block column, W once per
    # M-block row, bias per M-block row, output written once.
    bytes_accessed = (
        Mp * Kp * x.dtype.itemsize * gn
        + Kp * Np * w_packed.dtype.itemsize * gm
        + Np * b_packed.dtype.itemsize * gm
        + Mp * Np * jnp.dtype(out_dtype).itemsize
    )
    cost = pl.CostEstimate(
        flops=2 * Mp * Np * Kp,
        transcendentals=0,
        bytes_accessed=bytes_accessed,
    )

    y = pl.pallas_call(
        kernel,
        out_shape=jax.ShapeDtypeStruct((Mp, Np), out_dtype),
        grid_spec=pltpu.PrefetchScalarGridSpec(
            num_scalar_prefetch=0,
            grid=grid,
            in_specs=[
                pl.BlockSpec((tm, tk), lambda i, j, k: (i, k)),  # x tile
                pl.BlockSpec((tk, tn), lambda i, j, k: (k, j)),  # W^T tile
                pl.BlockSpec((1, tn), lambda i, j, k: (0, j)),   # bias tile
            ],
            out_specs=pl.BlockSpec((tm, tn), lambda i, j, k: (i, j)),
            scratch_shapes=scratch_shapes,
        ),
        compiler_params=pltpu.CompilerParams(
            # M/N parallel -> v7x megacore shards output blocks; K is the last
            # ("arbitrary") axis so the resident output/accumulator is valid.
            dimension_semantics=("parallel", "parallel", "arbitrary"),
        ),
        cost_estimate=cost,
    )(x, w_packed, b_packed)

    if (Mp, Np) != (M, N):
        # Remainder-only padding: for tile-aligned real workloads this branch
        # never fires, so the extra output copy stays out of the hot path.
        y = y[:M, :N]
    return y


if __name__ == "__main__":
    # Small shapes implied by the module: input_dim=32, output_dim=8, batch=4.
    input_dim, output_dim, batch = 32, 8, 4

    key = jax.random.PRNGKey(0)
    kx, kw, kb = jax.random.split(key, 3)

    # Deterministic PyTorch-style init: U(-1/sqrt(in), 1/sqrt(in)).
    bound = 1.0 / (input_dim ** 0.5)
    weight = jax.random.uniform(
        kw, (output_dim, input_dim), dtype=jnp.float32,
        minval=-bound, maxval=bound)
    bias = jax.random.uniform(
        kb, (output_dim,), dtype=jnp.float32, minval=-bound, maxval=bound)

    x = jax.random.normal(kx, (batch, input_dim), dtype=jnp.float32)

    # One-time param packing (init-time), then the per-call forward.
    w_packed, b_packed, meta = pack_linear_params(weight, bias)
    y = linear_forward(x, w_packed, b_packed, meta)
    y = jax.block_until_ready(y)

    # Reference check against plain JAX.
    y_ref = x @ weight.T + bias
    assert y.shape == (batch, output_dim)
    assert jnp.allclose(y, y_ref, atol=1e-5, rtol=1e-5)

    print("KERNEL_OK")
</pallas_src>

<mosaic_0001>
module attributes {stable_mosaic.version = 11 : i64} {
  func.func @_linear_kernel_f32(%arg0: i32, %arg1: i32, %arg2: i32, %arg3: memref<4x32xf32, #tpu.memory_space<vmem>>, %arg4: memref<32x8xf32, #tpu.memory_space<vmem>>, %arg5: memref<1x8xf32, #tpu.memory_space<vmem>>, %arg6: memref<4x8xf32, #tpu.memory_space<vmem>>) attributes {dimension_semantics = [#tpu.dimension_semantics<parallel>, #tpu.dimension_semantics<parallel>, #tpu.dimension_semantics<arbitrary>], iteration_bounds = array<i64: 1, 1, 1>, scalar_prefetch = 0 : i64, scratch_operands = 0 : i64, tpu.core_type = #tpu.core_type<tc>, window_params = [{transform_indices = @transform_0, window_bounds = array<i64: 4, 32>}, {transform_indices = @transform_1, window_bounds = array<i64: 32, 8>}, {transform_indices = @transform_2, window_bounds = array<i64: 1, 8>}, {transform_indices = @transform_3, window_bounds = array<i64: 4, 8>}]} {
    %c0_i32 = arith.constant 0 : i32
    %0 = arith.cmpi eq, %arg2, %c0_i32 : i32
    %1 = arith.extui %0 : i1 to i32
    %c0_i32_0 = arith.constant 0 : i32
    %2 = arith.cmpi ne, %1, %c0_i32_0 : i32
    scf.if %2 {
      %c0_8 = arith.constant 0 : index
      %c0_9 = arith.constant 0 : index
      %9 = vector.load %arg5[%c0_8, %c0_9] : memref<1x8xf32, #tpu.memory_space<vmem>>, vector<1x8xf32>
      %10 = vector.shape_cast %9 : vector<1x8xf32> to vector<1x8xf32>
      %11 = vector.broadcast %10 : vector<1x8xf32> to vector<4x8xf32>
      %c0_10 = arith.constant 0 : index
      %c0_11 = arith.constant 0 : index
      %12 = vector.load %arg6[%c0_10, %c0_11] : memref<4x8xf32, #tpu.memory_space<vmem>>, vector<4x8xf32>
      tpu.vector_store %arg6[%c0_10, %c0_11], %11 {strides = array<i32>} : memref<4x8xf32, #tpu.memory_space<vmem>>, vector<4x8xf32>,
    } else {
    }
    %c0 = arith.constant 0 : index
    %c0_1 = arith.constant 0 : index
    %3 = vector.load %arg6[%c0, %c0_1] : memref<4x8xf32, #tpu.memory_space<vmem>>, vector<4x8xf32>
    %c0_2 = arith.constant 0 : index
    %c0_3 = arith.constant 0 : index
    %4 = vector.load %arg3[%c0_2, %c0_3] : memref<4x32xf32, #tpu.memory_space<vmem>>, vector<4x32xf32>
    %c0_4 = arith.constant 0 : index
    %c0_5 = arith.constant 0 : index
    %5 = vector.load %arg4[%c0_4, %c0_5] : memref<32x8xf32, #tpu.memory_space<vmem>>, vector<32x8xf32>
    %cst = arith.constant dense<0.000000e+00> : vector<4x8xf32>
    %6 = tpu.matmul %4, %5, %cst {dimension_numbers = #tpu.dot_dimension_numbers<[1], [0], [0], [1], [0, 0, 1, 1], [], []>} : vector<4x32xf32>, vector<32x8xf32>, vector<4x8xf32> -> vector<4x8xf32>
    %7 = arith.addf %3, %6 : vector<4x8xf32>
    %c0_6 = arith.constant 0 : index
    %c0_7 = arith.constant 0 : index
    %8 = vector.load %arg6[%c0_6, %c0_7] : memref<4x8xf32, #tpu.memory_space<vmem>>, vector<4x8xf32>
    tpu.vector_store %arg6[%c0_6, %c0_7], %7 {strides = array<i32>} : memref<4x8xf32, #tpu.memory_space<vmem>>, vector<4x8xf32>,
    return
  }
  func.func @transform_0(%arg0: i32, %arg1: i32, %arg2: i32) -> (i32, i32) {
    %c0_i32 = arith.constant 0 : i32
    return %arg0, %arg2 : i32, i32
  }
  func.func @transform_1(%arg0: i32, %arg1: i32, %arg2: i32) -> (i32, i32) {
    %c0_i32 = arith.constant 0 : i32
    return %arg2, %arg1 : i32, i32
  }
  func.func @transform_2(%arg0: i32, %arg1: i32, %arg2: i32) -> (i32, i32) {
    %c0_i32 = arith.constant 0 : i32
    %c0_i32_0 = arith.constant 0 : i32
    return %c0_i32, %arg1 : i32, i32
  }
  func.func @transform_3(%arg0: i32, %arg1: i32, %arg2: i32) -> (i32, i32) {
    %c0_i32 = arith.constant 0 : i32
    return %arg0, %arg1 : i32, i32
  }
}

</mosaic_0001>

<bundles_post_ra>
// kernel: tpu_custom_call.1
= control target key start
LH: loop header
LB: loop body
LE: loop exit
PB: predicated region body
PF: predicated region fallthrough
CT: control target
= control target key end

     0   :  { %v168_v1 = vmov 0.0   ;;  %vm169_vm0 = vmmov 0   ;;  %vm26_vm1 = vcmask 60416   ;;  %s214_s0 = inlined_call_operand.vmem [shape: f32[4,32], index: 0, kind: input, shape index: {}]   ;;  %s215_s1 = inlined_call_operand.vmem [shape: f32[32,8], index: 1, kind: input, shape index: {}]   ;;  %s216_s2 = inlined_call_operand.vmem [shape: f32[1,8], index: 2, kind: input, shape index: {}]   ;;  %s217_s3 = inlined_call_operand.hbm [shape: f32[4,8], index: 3, kind: output, shape index: {}]  }
   0x1   :  { %v33_v0 = vld [vmem:[%s215_s1 + $0x18] sm:$0xff]  ;;  %132 = vmatprep.subr.mxu0 %v168_v1  ;;  %v32_v2 = vld [vmem:[%s215_s1 + $0x10] sm:$0xff]  ;;  %140 = vmatprep.mubr.msk.f32.mxu0 %vm169_vm0, %v168_v1  ;;  %v125_v3 = vld [vmem:[%s216_s2] ss:$0 sm:$0xff] }
   0x2   :  { %133 = vmatpush3.msra.mxu0 %v33_v0  ;;  %27 = vst.msk [vmem:[#allocation2] sm:$0xf] %vm26_vm1, %v125_v3 }
   0x3   :  { %8 = vsyncpa [#allocation3], 0  ;;  %134 = vmatprep.subr.mxu0 %v168_v1  ;;  %v31_v4 = vld [vmem:[%s215_s1 + $0x8] sm:$0xff]  ;;  %v30_v5 = vld [vmem:[%s215_s1] sm:$0xff]  ;;  %vm34_vm2 = vcmask 261120   ;;  %s170_s2 = smov [#allocation2]  }
   0x4   :  { %135 = vmatpush3.msra.mxu0 %v32_v2  ;;  %v29_v6 = vld [vmem:[%s214_s0] sm:$0xf]  ;;  %s117_s24 = sshll.u32 %s170_s2, 4  ;;  %s118_s24 = int_to_ptr.vmem [resolvable:$true] %s117_s24 }
   0x5   :  { %136 = vmatprep.subr.mxu0 %v168_v1  ;;  %s146_s25 = scalar_lea.vmem %s118_s24, 64  ;;  %p151_p1 = scmp.lt.s32.totalorder %s118_s24, %s118_s24 }
   0x6   :  { %137 = vmatpush3.msra.mxu0 %v31_v4  ;;  %p147_p0 = scmp.ne.s32.totalorder %s118_s24, %s146_s25  ;;  %p152_p2 = scmp.lt.s32.totalorder %s146_s25, %s146_s25 }
   0x7   :  { %138 = vmatprep.subr.mxu0 %v168_v1 }
   0x8   :  { %139 = vmatpush3.msra.mxu0 %v30_v5  ;;  %p153_p3 = por %p152_p2, %p151_p1 }
   0x9   :  { %141 = vmatmul.mubr.msk.f32.vlgmr.msra.gmra.mxu0 %vm34_vm2, %v29_v6  ;;  %v28_v7 = vld [vmem:[#allocation2] sm:$0xf] }
   0xa   :  { %p154_p4 = pnand %p153_p3, %p147_p0 }
  0xc9   :  { %v104_v8 = vpop.f32.mrf.mxu0 }
  0xca   :  { %v108_v9 = vadd.f32 %v104_v8, %v28_v7 }
  0xcb   :  { %v142_v10 = vpop.f32.mrf.mxu0 }
  0xcc   :  { %110 = vst.msk [vmem:[#allocation2] sm:$0xf] %vm26_vm1, %v108_v9 }
  0xcd   :  { %157 = shalt.err (!%p154_p4)
}
  0xce   :  { %120 = dma.vmem_to_hbm [thread:$0]  %s118_s24, 64, %s217_s3, [#allocation3]  }
  0xcf   :  { %166 = dma.done.wait [#allocation3], 64  }
  0xd0   :  { %167 = vsyncadd [#allocation3], 4294967232 }
  0xd1   :  { %124 = vsyncpa [#allocation3], 1 }

</bundles_post_ra>
